<compile_context>
chip_gen: v5e
topology: v5e:2x2
jax: 0.10.0
libtpu: 0.0.40
codegen_flags: <defaults>
</compile_context>

<pallas_src>
import jax
import jax.numpy as jnp
from jax.experimental import pallas as pl
from jax.experimental.pallas import tpu as pltpu


def vdnet_kernel(xt_ref, w1_ref, b1_ref, w2_ref, b2_ref, w3_ref, b3_ref,
                 dv_ref, dsum_ref):
    """One batch tile (batch on the 128-lane axis): fused [v|d] MLP.

    Outputs:
      dv_ref   (A, TB): d + v                (advantage + state value)
      dsum_ref (1, TB): sum_a d[a, :]        (per-sample advantage sum, feeds
                                              the global d.mean() epilogue)
    """
    cdt = w1_ref.dtype                      # MXU input dtype (bf16); f32 accumulation.
    a = dv_ref.shape[0]                     # num_act

    xt = xt_ref[...].astype(cdt)            # in-kernel f32->bf16 cast (free VPU op)

    # layer 1 (row-stacked streams): (384, F) @ (F, TB)
    h = jnp.dot(w1_ref[...], xt, preferred_element_type=jnp.float32) + b1_ref[...]
    h = jnp.maximum(h, 0.0)
    # layer 2 (block-diagonal): (64, 384) @ (384, TB)
    h = jnp.dot(w2_ref[...], h.astype(cdt),
                preferred_element_type=jnp.float32) + b2_ref[...]
    h = jnp.maximum(h, 0.0)
    # layer 3 (packed [d ; v] head): (1+A, 64) @ (64, TB)
    vd = jnp.dot(w3_ref[...], h.astype(cdt),
                 preferred_element_type=jnp.float32) + b3_ref[...]

    d = vd[:a, :]                           # (A, TB)
    v = vd[a:, :]                           # (1, TB)
    dv_ref[...] = d + v
    dsum_ref[...] = jnp.sum(d, axis=0, keepdims=True)


def fuse_params(p, compute_dtype=jnp.bfloat16):
    """Fuse vnet/dnet into 3 transposed matmuls (batch-on-lanes formulation).

    Input params use (in, out) weights and (1, out) biases (i.e. y = x @ W + b).
    Output weights are (out, in) and biases (out, 1) so the kernel can compute
    W @ x^T + b with the batch on the lane axis.
    """
    vh1, dh1 = p["vw1"].shape[1], p["dw1"].shape[1]   # 128, 256
    vh2, dh2 = p["vw2"].shape[1], p["dw2"].shape[1]   # 32, 32
    vo, do = p["vw3"].shape[1], p["dw3"].shape[1]     # 1, num_act

    w1 = jnp.concatenate([p["vw1"].T, p["dw1"].T], axis=0)          # (384, F)
    b1 = jnp.concatenate([p["vb1"].T, p["db1"].T], axis=0)          # (384, 1)

    w2 = jnp.zeros((vh2 + dh2, vh1 + dh1), jnp.float32)             # (64, 384)
    w2 = w2.at[:vh2, :vh1].set(p["vw2"].T).at[vh2:, vh1:].set(p["dw2"].T)
    b2 = jnp.concatenate([p["vb2"].T, p["db2"].T], axis=0)          # (64, 1)

    # packed head, rows [0:A] = dnet (reads h2[32:]), row [A] = vnet (reads h2[:32])
    w3 = jnp.zeros((do + vo, vh2 + dh2), jnp.float32)               # (1+A, 64)
    w3 = w3.at[:do, vh2:].set(p["dw3"].T).at[do:, :vh2].set(p["vw3"].T)
    b3 = jnp.concatenate([p["db3"].T, p["vb3"].T], axis=0)          # (1+A, 1)

    return {
        "w1": w1.astype(compute_dtype), "b1": b1,   # biases stay f32 (f32 bias/ReLU path)
        "w2": w2.astype(compute_dtype), "b2": b2,
        "w3": w3.astype(compute_dtype), "b3": b3,
    }


def _pick_tile(B, block_b):
    """Lane-axis batch tile: either the full (small) batch, or a multiple of 128.

    For B > 128 we guarantee >= 2 grid steps so the 'parallel' batch axis can be
    sharded across v7x's two TensorCores (harmless on single-TC v5e/v6e)."""
    if B <= 128:
        return B
    half = -(-B // 2)
    half_128 = -(-half // 128) * 128
    return min(block_b, half_128)


def vdnet_forward(x, fused, *, block_b=1024, vmem_limit_bytes=None):
    """x: (B, F) float32.  fused: output of fuse_params.  Returns (B, num_act) f32.

    block_b: lane-axis batch tile upper bound (multiple of 128). Sweep per
    generation: up to 2048-8192 on v5e/v6e (128 MiB VMEM), cap ~4096 on v7x
    (64 MiB VMEM)."""
    B, F = x.shape
    H1 = fused["w1"].shape[0]          # 384
    H2 = fused["w2"].shape[0]          # 64
    H3 = fused["w3"].shape[0]          # 1 + num_act
    A = H3 - 1

    assert block_b % 128 == 0 and block_b > 0
    TB = _pick_tile(B, block_b)
    n_tiles = pl.cdiv(B, TB)
    B_pad = n_tiles * TB

    # Batch-on-lanes layout: one cheap XLA transpose of x (the f32->bf16 cast
    # happens inside the kernel, hidden under the BlockSpec pipeline).
    xt = x.T                                                    # (F, B)
    if B_pad != B:
        xt = jnp.pad(xt, ((0, 0), (0, B_pad - B)))              # zero-pad batch

    if vmem_limit_bytes is None:
        # Rough per-tile footprint: pipelined x/out tiles + f32 & bf16
        # intermediates + double-buffered weights; 2x headroom, clamped so a
        # big-TB sweep still fits v7x's 64 MiB physical VMEM.
        per_tile = TB * (F * (4 + 2) * 2 + (H1 + H2) * (4 + 2) + (H3 + 1) * 8)
        weights = 2 * sum(int(v.size) * v.dtype.itemsize for v in fused.values())
        vmem_limit_bytes = int(min(max(32 << 20, 2 * (per_tile + weights)), 64 << 20))

    flops = 2 * B_pad * (F * H1 + H1 * H2 + H2 * H3)
    bytes_accessed = int(
        B_pad * F * 4
        + sum(int(v.size) * v.dtype.itemsize for v in fused.values())
        + B_pad * H3 * 4
    )

    dv, dsum = pl.pallas_call(
        vdnet_kernel,
        out_shape=(
            jax.ShapeDtypeStruct((A, B_pad), jnp.float32),      # d + v   (lane-dense)
            jax.ShapeDtypeStruct((1, B_pad), jnp.float32),      # sum_a d (lane-dense)
        ),
        grid_spec=pltpu.PrefetchScalarGridSpec(
            num_scalar_prefetch=0,
            grid=(n_tiles,),
            in_specs=[
                pl.BlockSpec((F, TB), lambda i: (0, i)),             # x^T: tiled over batch
                pl.BlockSpec(fused["w1"].shape, lambda i: (0, 0)),   # weights: VMEM-resident
                pl.BlockSpec(fused["b1"].shape, lambda i: (0, 0)),
                pl.BlockSpec(fused["w2"].shape, lambda i: (0, 0)),
                pl.BlockSpec(fused["b2"].shape, lambda i: (0, 0)),
                pl.BlockSpec(fused["w3"].shape, lambda i: (0, 0)),
                pl.BlockSpec(fused["b3"].shape, lambda i: (0, 0)),
            ],
            out_specs=[
                pl.BlockSpec((A, TB), lambda i: (0, i)),
                pl.BlockSpec((1, TB), lambda i: (0, i)),
            ],
        ),
        compiler_params=pltpu.CompilerParams(
            # batch tiles are fully independent (the global mean is an epilogue)
            dimension_semantics=("parallel",),
            vmem_limit_bytes=vmem_limit_bytes,
        ),
        cost_estimate=pl.CostEstimate(
            flops=flops, transcendentals=0, bytes_accessed=bytes_accessed),
    )(xt, fused["w1"], fused["b1"], fused["w2"], fused["b2"],
      fused["w3"], fused["b3"])

    # Dueling combine.  The PyTorch module uses d.mean() with NO dim argument,
    # i.e. a GLOBAL mean over the whole (B, A) advantage tensor -> it couples
    # every batch tile and lives outside the parallel-tiled kernel.  The kernel
    # already produced d + v and per-sample sum(d), so this is just a B-element
    # reduce, a subtract, and the transpose back to (B, A).
    dv = dv[:, :B]
    mean_d = jnp.sum(dsum[0, :B]) * (1.0 / (B * A))
    return (dv - mean_d).T


def init_params(key, num_feature, num_act):
    """Deterministic synthetic init (PyTorch-style U(-1/sqrt(fan_in), +1/sqrt(fan_in))).
    Weights stored as (in, out), biases as (1, out), so layers are x @ W + b."""
    dims = {
        "v1": (num_feature, 128),
        "v2": (128, 32),
        "v3": (32, 1),
        "d1": (num_feature, 256),
        "d2": (256, 32),
        "d3": (32, num_act),
    }
    params = {}
    keys = jax.random.split(key, 2 * len(dims))
    for i, (name, (fan_in, fan_out)) in enumerate(dims.items()):
        bound = 1.0 / jnp.sqrt(jnp.float32(fan_in))
        w = jax.random.uniform(keys[2 * i], (fan_in, fan_out), jnp.float32, -bound, bound)
        b = jax.random.uniform(keys[2 * i + 1], (1, fan_out), jnp.float32, -bound, bound)
        prefix = "v" if name[0] == "v" else "d"
        idx = name[1]
        params[f"{prefix}w{idx}"] = w
        params[f"{prefix}b{idx}"] = b
    return params


def vdnet_reference(x, p, compute_dtype=jnp.float32):
    """Pure-JAX reference of the PyTorch forward (d + v - d.mean(), global mean).
    compute_dtype=bf16 emulates the kernel's bf16-MXU-inputs / f32-accumulate math."""
    def lin(a, w, b):
        return jnp.dot(a.astype(compute_dtype), w.astype(compute_dtype),
                       preferred_element_type=jnp.float32) + b
    h = jnp.maximum(lin(x, p["vw1"], p["vb1"]), 0.0)
    h = jnp.maximum(lin(h, p["vw2"], p["vb2"]), 0.0)
    v = lin(h, p["vw3"], p["vb3"])
    g = jnp.maximum(lin(x, p["dw1"], p["db1"]), 0.0)
    g = jnp.maximum(lin(g, p["dw2"], p["db2"]), 0.0)
    d = lin(g, p["dw3"], p["db3"])
    return d + v - jnp.mean(d)


if __name__ == "__main__":
    num_feature = 16
    num_act = 4

    key = jax.random.PRNGKey(0)
    k_x, k_p, k_x2 = jax.random.split(key, 3)
    params = init_params(k_p, num_feature, num_act)
    fused = fuse_params(params, compute_dtype=jnp.bfloat16)
    fwd = jax.jit(vdnet_forward)

    # Small-batch case (single tile).
    batch = 2
    x = jax.random.normal(k_x, (batch, num_feature), jnp.float32)
    out = jax.block_until_ready(fwd(x, fused))
    assert out.shape == (batch, num_act)
    ref_bf16 = vdnet_reference(x, params, compute_dtype=jnp.bfloat16)
    assert jnp.allclose(out, ref_bf16, atol=1e-3, rtol=1e-3), "mismatch vs bf16 reference"
    ref_f32 = vdnet_reference(x, params, compute_dtype=jnp.float32)
    assert jnp.allclose(out, ref_f32, atol=1e-1, rtol=1e-1), "mismatch vs f32 reference"

    # Multi-tile case (exercises the 128-aligned batch tiling + padding path).
    batch2 = 384
    x2 = jax.random.normal(k_x2, (batch2, num_feature), jnp.float32)
    out2 = jax.block_until_ready(fwd(x2, fused))
    assert out2.shape == (batch2, num_act)
    ref2 = vdnet_reference(x2, params, compute_dtype=jnp.bfloat16)
    assert jnp.allclose(out2, ref2, atol=1e-3, rtol=1e-3), "mismatch vs bf16 reference (tiled)"

    print("KERNEL_OK")
</pallas_src>

<mosaic_0001>
module attributes {stable_mosaic.version = 11 : i64} {
  func.func @vdnet_kernel(%arg0: i32, %arg1: memref<16x2xf32, #tpu.memory_space<vmem>>, %arg2: memref<384x16xbf16, #tpu.memory_space<vmem>>, %arg3: memref<384x1xf32, #tpu.memory_space<vmem>>, %arg4: memref<64x384xbf16, #tpu.memory_space<vmem>>, %arg5: memref<64x1xf32, #tpu.memory_space<vmem>>, %arg6: memref<5x64xbf16, #tpu.memory_space<vmem>>, %arg7: memref<5x1xf32, #tpu.memory_space<vmem>>, %arg8: memref<4x2xf32, #tpu.memory_space<vmem>>, %arg9: memref<1x2xf32, #tpu.memory_space<vmem>>) attributes {dimension_semantics = [#tpu.dimension_semantics<parallel>], iteration_bounds = array<i64: 1>, scalar_prefetch = 0 : i64, scratch_operands = 0 : i64, tpu.core_type = #tpu.core_type<tc>, window_params = [{transform_indices = @transform_0, window_bounds = array<i64: 16, 2>}, {pipeline_mode = #tpu.pipeline_mode<synchronous>, transform_indices = @transform_1, window_bounds = array<i64: 384, 16>}, {pipeline_mode = #tpu.pipeline_mode<synchronous>, transform_indices = @transform_2, window_bounds = array<i64: 384, 1>}, {pipeline_mode = #tpu.pipeline_mode<synchronous>, transform_indices = @transform_3, window_bounds = array<i64: 64, 384>}, {pipeline_mode = #tpu.pipeline_mode<synchronous>, transform_indices = @transform_4, window_bounds = array<i64: 64, 1>}, {pipeline_mode = #tpu.pipeline_mode<synchronous>, transform_indices = @transform_5, window_bounds = array<i64: 5, 64>}, {pipeline_mode = #tpu.pipeline_mode<synchronous>, transform_indices = @transform_6, window_bounds = array<i64: 5, 1>}, {transform_indices = @transform_7, window_bounds = array<i64: 4, 2>}, {transform_indices = @transform_8, window_bounds = array<i64: 1, 2>}]} {
    %c0 = arith.constant 0 : index
    %c0_0 = arith.constant 0 : index
    %0 = vector.load %arg1[%c0, %c0_0] : memref<16x2xf32, #tpu.memory_space<vmem>>, vector<16x2xf32>
    %1 = arith.truncf %0 : vector<16x2xf32> to vector<16x2xbf16>
    %c0_1 = arith.constant 0 : index
    %c0_2 = arith.constant 0 : index
    %2 = vector.load %arg2[%c0_1, %c0_2] : memref<384x16xbf16, #tpu.memory_space<vmem>>, vector<384x16xbf16>
    %cst = arith.constant dense<0.000000e+00> : vector<384x2xf32>
    %3 = tpu.matmul %2, %1, %cst {dimension_numbers = #tpu.dot_dimension_numbers<[1], [0], [0], [1], [0, 0, 1, 1], [], []>} : vector<384x16xbf16>, vector<16x2xbf16>, vector<384x2xf32> -> vector<384x2xf32>
    %c0_3 = arith.constant 0 : index
    %c0_4 = arith.constant 0 : index
    %4 = vector.load %arg3[%c0_3, %c0_4] : memref<384x1xf32, #tpu.memory_space<vmem>>, vector<384x1xf32>
    %5 = vector.broadcast %4 : vector<384x1xf32> to vector<384x2xf32>
    %6 = arith.addf %3, %5 : vector<384x2xf32>
    %cst_5 = arith.constant 0.000000e+00 : f32
    %7 = vector.broadcast %cst_5 : f32 to vector<384x2xf32>
    %8 = arith.maximumf %6, %7 : vector<384x2xf32>
    %c0_6 = arith.constant 0 : index
    %c0_7 = arith.constant 0 : index
    %9 = vector.load %arg4[%c0_6, %c0_7] : memref<64x384xbf16, #tpu.memory_space<vmem>>, vector<64x384xbf16>
    %10 = arith.truncf %8 : vector<384x2xf32> to vector<384x2xbf16>
    %cst_8 = arith.constant dense<0.000000e+00> : vector<64x2xf32>
    %11 = tpu.matmul %9, %10, %cst_8 {dimension_numbers = #tpu.dot_dimension_numbers<[1], [0], [0], [1], [0, 0, 1, 1], [], []>} : vector<64x384xbf16>, vector<384x2xbf16>, vector<64x2xf32> -> vector<64x2xf32>
    %c0_9 = arith.constant 0 : index
    %c0_10 = arith.constant 0 : index
    %12 = vector.load %arg5[%c0_9, %c0_10] : memref<64x1xf32, #tpu.memory_space<vmem>>, vector<64x1xf32>
    %13 = vector.broadcast %12 : vector<64x1xf32> to vector<64x2xf32>
    %14 = arith.addf %11, %13 : vector<64x2xf32>
    %cst_11 = arith.constant 0.000000e+00 : f32
    %15 = vector.broadcast %cst_11 : f32 to vector<64x2xf32>
    %16 = arith.maximumf %14, %15 : vector<64x2xf32>
    %c0_12 = arith.constant 0 : index
    %c0_13 = arith.constant 0 : index
    %17 = vector.load %arg6[%c0_12, %c0_13] : memref<5x64xbf16, #tpu.memory_space<vmem>>, vector<5x64xbf16>
    %18 = arith.truncf %16 : vector<64x2xf32> to vector<64x2xbf16>
    %cst_14 = arith.constant dense<0.000000e+00> : vector<5x2xf32>
    %19 = tpu.matmul %17, %18, %cst_14 {dimension_numbers = #tpu.dot_dimension_numbers<[1], [0], [0], [1], [0, 0, 1, 1], [], []>} : vector<5x64xbf16>, vector<64x2xbf16>, vector<5x2xf32> -> vector<5x2xf32>
    %c0_15 = arith.constant 0 : index
    %c0_16 = arith.constant 0 : index
    %20 = vector.load %arg7[%c0_15, %c0_16] : memref<5x1xf32, #tpu.memory_space<vmem>>, vector<5x1xf32>
    %21 = vector.broadcast %20 : vector<5x1xf32> to vector<5x2xf32>
    %22 = arith.addf %19, %21 : vector<5x2xf32>
    %23 = vector.extract_strided_slice %22 {offsets = [0, 0], sizes = [4, 2], strides = [1, 1]} : vector<5x2xf32> to vector<4x2xf32>
    %24 = vector.extract_strided_slice %22 {offsets = [4, 0], sizes = [1, 2], strides = [1, 1]} : vector<5x2xf32> to vector<1x2xf32>
    %25 = vector.broadcast %24 : vector<1x2xf32> to vector<4x2xf32>
    %26 = arith.addf %23, %25 : vector<4x2xf32>
    %c0_17 = arith.constant 0 : index
    %c0_18 = arith.constant 0 : index
    %27 = vector.load %arg8[%c0_17, %c0_18] : memref<4x2xf32, #tpu.memory_space<vmem>>, vector<4x2xf32>
    tpu.vector_store %arg8[%c0_17, %c0_18], %26 {strides = array<i32>} : memref<4x2xf32, #tpu.memory_space<vmem>>, vector<4x2xf32>,
    %cst_19 = arith.constant dense<0.000000e+00> : vector<2xf32>
    %28 = vector.multi_reduction <add>, %23, %cst_19 [0] : vector<4x2xf32> to vector<2xf32>
    %29 = vector.shape_cast %28 : vector<2xf32> to vector<1x2xf32>
    %c0_20 = arith.constant 0 : index
    %c0_21 = arith.constant 0 : index
    %30 = vector.load %arg9[%c0_20, %c0_21] : memref<1x2xf32, #tpu.memory_space<vmem>>, vector<1x2xf32>
    tpu.vector_store %arg9[%c0_20, %c0_21], %29 {strides = array<i32>} : memref<1x2xf32, #tpu.memory_space<vmem>>, vector<1x2xf32>,
    return
  }
  func.func @transform_0(%arg0: i32) -> (i32, i32) {
    %c0_i32 = arith.constant 0 : i32
    %c0_i32_0 = arith.constant 0 : i32
    return %c0_i32, %arg0 : i32, i32
  }
  func.func @transform_1(%arg0: i32) -> (i32, i32) {
    %c0_i32 = arith.constant 0 : i32
    %c0_i32_0 = arith.constant 0 : i32
    %c0_i32_1 = arith.constant 0 : i32
    return %c0_i32, %c0_i32_0 : i32, i32
  }
  func.func @transform_2(%arg0: i32) -> (i32, i32) {
    %c0_i32 = arith.constant 0 : i32
    %c0_i32_0 = arith.constant 0 : i32
    %c0_i32_1 = arith.constant 0 : i32
    return %c0_i32, %c0_i32_0 : i32, i32
  }
  func.func @transform_3(%arg0: i32) -> (i32, i32) {
    %c0_i32 = arith.constant 0 : i32
    %c0_i32_0 = arith.constant 0 : i32
    %c0_i32_1 = arith.constant 0 : i32
    return %c0_i32, %c0_i32_0 : i32, i32
  }
  func.func @transform_4(%arg0: i32) -> (i32, i32) {
    %c0_i32 = arith.constant 0 : i32
    %c0_i32_0 = arith.constant 0 : i32
    %c0_i32_1 = arith.constant 0 : i32
    return %c0_i32, %c0_i32_0 : i32, i32
  }
  func.func @transform_5(%arg0: i32) -> (i32, i32) {
    %c0_i32 = arith.constant 0 : i32
    %c0_i32_0 = arith.constant 0 : i32
    %c0_i32_1 = arith.constant 0 : i32
    return %c0_i32, %c0_i32_0 : i32, i32
  }
  func.func @transform_6(%arg0: i32) -> (i32, i32) {
    %c0_i32 = arith.constant 0 : i32
    %c0_i32_0 = arith.constant 0 : i32
    %c0_i32_1 = arith.constant 0 : i32
    return %c0_i32, %c0_i32_0 : i32, i32
  }
  func.func @transform_7(%arg0: i32) -> (i32, i32) {
    %c0_i32 = arith.constant 0 : i32
    %c0_i32_0 = arith.constant 0 : i32
    return %c0_i32, %arg0 : i32, i32
  }
  func.func @transform_8(%arg0: i32) -> (i32, i32) {
    %c0_i32 = arith.constant 0 : i32
    %c0_i32_0 = arith.constant 0 : i32
    return %c0_i32, %arg0 : i32, i32
  }
}

</mosaic_0001>

<bundles_post_ra>
// kernel: vdnet_forward.1
= control target key start
LH: loop header
LB: loop body
LE: loop exit
PB: predicated region body
PF: predicated region fallthrough
CT: control target
= control target key end

     0   :  { %v1245_v0 = vmov 0   ;;  %vm488_vm0 = vcmask 130048   ;;  %vm996_vm1 = vcmask 523264   ;;  %vm1015_vm2 = vcmask 11264   ;;  %s1801_s2 = inlined_call_operand.vmem [shape: f32[384,1], index: 2, kind: input, shape index: {}]   ;;  %s1802_s0 = inlined_call_operand.vmem [shape: f32[16,2], index: 0, kind: input, shape index: {}]   ;;  %s1803_s1 = inlined_call_operand.vmem [shape: bf16[384,16], index: 1, kind: input, shape index: {}]   ;;  %s1804_s4 = inlined_call_operand.vmem [shape: f32[64,1], index: 4, kind: input, shape index: {}]   ;;  %s1805_s6 = inlined_call_operand.vmem [shape: f32[5,1], index: 6, kind: input, shape index: {}]   ;;  %s1806_s3 = inlined_call_operand.vmem [shape: bf16[64,384], index: 3, kind: input, shape index: {}]   ;;  %s1807_s5 = inlined_call_operand.vmem [shape: bf16[5,64], index: 5, kind: input, shape index: {}]   ;;  %s1808_s7 = inlined_call_operand.vmem [shape: f32[4,2], index: 7, kind: output, shape index: {0}]   ;;  %s1809_s8 = inlined_call_operand.vmem [shape: f32[1,2], index: 8, kind: output, shape index: {1}]  }
   0x1   :  { %1244 = vset.pattern.permute.xlu2 %v1245_v0  ;;  %1243 = vset.pattern.permute.xlu1 %v1245_v0  ;;  %v126_v1 = vld [vmem:[%s1801_s2 + $0x170] sm:$0xff]  ;;  %v29_v4 = vld [vmem:[%s1802_s0] sm:$0xff]  ;;  %v30_v5 = vld [vmem:[%s1802_s0 + $0x8] sm:$0xff]  ;;  %vm1024_vm3 = vcmask 8192  }
   0x2   :  { %v110_v2 = vld [vmem:[%s1801_s2 + $0xf0] sm:$0xff]  ;;  %1242 = vset.pattern.permute.xlu0 %v1245_v0  ;;  %360 = vperm.xlu1 %1243, %v126_v1   ;;  %v31_v6 = vpack.c.bf16 %v30_v5, %v29_v4  ;;  %v1203_v7 = vld [vmem:[%s1803_s1] sm:$0xff]  ;;  %v1214_v8 = vld [vmem:[%s1803_s1 + $0x58] sm:$0xff] }
   0x3   :  { %v94_v3 = vld [vmem:[%s1801_s2 + $0x70] sm:$0xff]  ;;  %280 = vperm.xlu0 %1242, %v110_v2   ;;  %v1220_v9 = vld [vmem:[%s1803_s1 + $0x88] sm:$0xff]  ;;  %v127_v10 = vld [vmem:[%s1801_s2 + $0x178] sm:$0xff] }
   0x4   :  { %200 = vperm.xlu2 %1244, %v94_v3   ;;  %568 = vmatpush.bf16.msra.mxu0 %v31_v6  ;;  %v111_v11 = vld [vmem:[%s1801_s2 + $0xf8] sm:$0xff]  ;;  %v109_v13 = vld [vmem:[%s1801_s2 + $0xe8] sm:$0xff]  ;;  %v108_v14 = vld [vmem:[%s1801_s2 + $0xe0] sm:$0xff] }
   0x5   :  { %1239 = vmatpush.bf16.msra.mxu2 %v31_v6  ;;  %1240 = vmatpush.bf16.msra.mxu3 %v31_v6  ;;  %v95_v12 = vld [vmem:[%s1801_s2 + $0x78] sm:$0xff]  ;;  %v124_v15 = vld [vmem:[%s1801_s2 + $0x160] sm:$0xff]  ;;  %v1204_v16 = vld [vmem:[%s1803_s1 + $0x8] sm:$0xff] }
   0x6   :  { %v1215_v17 = vld [vmem:[%s1803_s1 + $0x60] sm:$0xff]  ;;  %v1221_v18 = vld [vmem:[%s1803_s1 + $0x90] sm:$0xff]  ;;  %v125_v20 = vld [vmem:[%s1801_s2 + $0x168] sm:$0xff] }
   0x7   :  { %1130 = vmatmul.msk.bf16.vlgmr.msra.gmra.mxu0 %vm488_vm0, %v1203_v7  ;;  %v92_v19 = vld [vmem:[%s1801_s2 + $0x60] sm:$0xff]  ;;  %v93_v21 = vld [vmem:[%s1801_s2 + $0x68] sm:$0xff]  ;;  %v107_v22 = vld [vmem:[%s1801_s2 + $0xd8] sm:$0xff] }
   0x8   :  { %1141 = vmatmul.msk.bf16.vlgmr.msra.gmra.mxu2 %vm488_vm0, %v1214_v8  ;;  %1147 = vmatmul.msk.bf16.vlgmr.msra.gmra.mxu3 %vm488_vm0, %v1220_v9  ;;  %v106_v23 = vld [vmem:[%s1801_s2 + $0xd0] sm:$0xff]  ;;  %v1216_v26 = vld [vmem:[%s1803_s1 + $0x68] sm:$0xff]  ;;  %v1222_v27 = vld [vmem:[%s1803_s1 + $0x98] sm:$0xff] }
   0x9   :  { %v122_v24 = vld [vmem:[%s1801_s2 + $0x150] sm:$0xff]  ;;  %v123_v29 = vld [vmem:[%s1801_s2 + $0x158] sm:$0xff]  ;;  %v105_v31 = vld [vmem:[%s1801_s2 + $0xc8] sm:$0xff] }
   0xa   :  { %365 = vperm.xlu1 %1243, %v127_v10   ;;  %v1205_v25 = vld [vmem:[%s1803_s1 + $0x10] sm:$0xff]  ;;  %v91_v30 = vld [vmem:[%s1801_s2 + $0x58] sm:$0xff]  ;;  %v104_v32 = vld [vmem:[%s1801_s2 + $0xc0] sm:$0xff] }
   0xb   :  { %285 = vperm.xlu0 %1242, %v111_v11   ;;  %v90_v28 = vld [vmem:[%s1801_s2 + $0x50] sm:$0xff]  ;;  %v120_v33 = vld [vmem:[%s1801_s2 + $0x140] sm:$0xff]  ;;  %v1206_v34 = vld [vmem:[%s1803_s1 + $0x18] sm:$0xff] }
   0xc   :  { %205 = vperm.xlu2 %1244, %v95_v12   ;;  %v1217_v35 = vld [vmem:[%s1803_s1 + $0x70] sm:$0xff]  ;;  %v1223_v36 = vld [vmem:[%s1803_s1 + $0xa0] sm:$0xff]  ;;  %v121_v38 = vld [vmem:[%s1801_s2 + $0x148] sm:$0xff] }
   0xd   :  { %v88_v37 = vld [vmem:[%s1801_s2 + $0x40] sm:$0xff]  ;;  %v89_v39 = vld [vmem:[%s1801_s2 + $0x48] sm:$0xff]  ;;  %v103_v40 = vld [vmem:[%s1801_s2 + $0xb8] sm:$0xff] }
   0xe   :  { %v102_v41 = vld [vmem:[%s1801_s2 + $0xb0] sm:$0xff]  ;;  %v1207_v43 = vld [vmem:[%s1803_s1 + $0x20] sm:$0xff]  ;;  %v1218_v44 = vld [vmem:[%s1803_s1 + $0x78] sm:$0xff] }
   0xf   :  { %v118_v42 = vld [vmem:[%s1801_s2 + $0x130] sm:$0xff]  ;;  %v1224_v45 = vld [vmem:[%s1803_s1 + $0xa8] sm:$0xff]  ;;  %v119_v47 = vld [vmem:[%s1801_s2 + $0x138] sm:$0xff] }
  0x10   :  { %v86_v46 = vld [vmem:[%s1801_s2 + $0x30] sm:$0xff]  ;;  %v87_v48 = vld [vmem:[%s1801_s2 + $0x38] sm:$0xff]  ;;  %v101_v49 = vld [vmem:[%s1801_s2 + $0xa8] sm:$0xff] }
  0x11   :  { %v100_v50 = vld [vmem:[%s1801_s2 + $0xa0] sm:$0xff]  ;;  %v1208_v52 = vld [vmem:[%s1803_s1 + $0x28] sm:$0xff]  ;;  %v1225_v54 = vld [vmem:[%s1803_s1 + $0xb0] sm:$0xff] }
  0x12   :  { %275 = vperm.xlu1 %1243, %v109_v13   ;;  %v116_v51 = vld [vmem:[%s1801_s2 + $0x120] sm:$0xff]  ;;  %v117_v56 = vld [vmem:[%s1801_s2 + $0x128] sm:$0xff]  ;;  %v99_v59 = vld [vmem:[%s1801_s2 + $0x98] sm:$0xff] }
  0x13   :  { %270 = vperm.xlu0 %1242, %v108_v14   ;;  %v1219_v53 = vld [vmem:[%s1803_s1 + $0x80] sm:$0xff]  ;;  %v85_v57 = vld [vmem:[%s1801_s2 + $0x28] sm:$0xff]  ;;  %v98_v60 = vld [vmem:[%s1801_s2 + $0x90] sm:$0xff] }
  0x14   :  { %350 = vperm.xlu2 %1244, %v124_v15   ;;  %v84_v55 = vld [vmem:[%s1801_s2 + $0x20] sm:$0xff]  ;;  %v114_v61 = vld [vmem:[%s1801_s2 + $0x110] sm:$0xff]  ;;  %v1226_v0 = vld [vmem:[%s1803_s1 + $0xb8] sm:$0xff] }
  0x15   :  { %v1209_v62 = vld [vmem:[%s1803_s1 + $0x30] sm:$0xff]  ;;  %v115_v2 = vld [vmem:[%s1801_s2 + $0x118] sm:$0xff]  ;;  %v97_v5 = vld [vmem:[%s1801_s2 + $0x88] sm:$0xff] }
  0x16   :  { %v82_v1 = vld [vmem:[%s1801_s2 + $0x10] sm:$0xff]  ;;  %v83_v3 = vld [vmem:[%s1801_s2 + $0x18] sm:$0xff]  ;;  %v96_v6 = vld [vmem:[%s1801_s2 + $0x80] sm:$0xff] }
  0x17   :  { %1131 = vmatmul.msk.bf16.gmra.mxu0 %vm488_vm0, %v1204_v16  ;;  %v112_v7 = vld [vmem:[%s1801_s2 + $0x100] sm:$0xff]  ;;  %v1210_v9 = vld [vmem:[%s1803_s1 + $0x38] sm:$0xff]  ;;  %v113_v13 = vld [vmem:[%s1801_s2 + $0x108] sm:$0xff] }
  0x18   :  { %1142 = vmatmul.msk.bf16.gmra.mxu2 %vm488_vm0, %v1215_v17  ;;  %1148 = vmatmul.msk.bf16.gmra.mxu3 %vm488_vm0, %v1221_v18  ;;  %v80_v12 = vld [vmem:[%s1801_s2] sm:$0xff]  ;;  %v81_v14 = vld [vmem:[%s1801_s2 + $0x8] sm:$0xff]  ;;  %v785_v18 = vld [vmem:[%s1804_s4 + $0x38] sm:$0xff] }
  0x1a   :  { %190 = vperm.xlu1 %1243, %v92_v19   ;;  %v784_v19 = vld [vmem:[%s1804_s4 + $0x30] sm:$0xff] }
  0x1b   :  { %355 = vperm.xlu0 %1242, %v125_v20   ;;  %v782_v20 = vld [vmem:[%s1804_s4 + $0x20] sm:$0xff] }
  0x1c   :  { %195 = vperm.xlu2 %1244, %v93_v21  }
  0x22   :  { %265 = vperm.xlu1 %1243, %v107_v22   ;;  %v1211_v22 = vld [vmem:[%s1803_s1 + $0x40] sm:$0xff] }
  0x23   :  { %260 = vperm.xlu0 %1242, %v106_v23  }
  0x24   :  { %340 = vperm.xlu2 %1244, %v122_v24  }
  0x27   :  { %1132 = vmatmul.msk.bf16.gmra.mxu0 %vm488_vm0, %v1205_v25 }
  0x28   :  { %1143 = vmatmul.msk.bf16.gmra.mxu2 %vm488_vm0, %v1216_v26  ;;  %1149 = vmatmul.msk.bf16.gmra.mxu3 %vm488_vm0, %v1222_v27  ;;  %v780_v26 = vld [vmem:[%s1804_s4 + $0x10] sm:$0xff]  ;;  %v783_v27 = vld [vmem:[%s1804_s4 + $0x28] sm:$0xff] }
  0x2a   :  { %180 = vperm.xlu1 %1243, %v90_v28   ;;  %v781_v28 = vld [vmem:[%s1804_s4 + $0x18] sm:$0xff] }
  0x2b   :  { %345 = vperm.xlu0 %1242, %v123_v29  }
  0x2c   :  { %185 = vperm.xlu2 %1244, %v91_v30  }
  0x32   :  { %255 = vperm.xlu1 %1243, %v105_v31  }
  0x33   :  { %250 = vperm.xlu0 %1242, %v104_v32  }
  0x34   :  { %330 = vperm.xlu2 %1244, %v120_v33  }
  0x37   :  { %1133 = vmatmul.msk.bf16.gmra.mxu0 %vm488_vm0, %v1206_v34  ;;  %v779_v34 = vld [vmem:[%s1804_s4 + $0x8] sm:$0xff] }
  0x38   :  { %1144 = vmatmul.msk.bf16.gmra.mxu2 %vm488_vm0, %v1217_v35  ;;  %1150 = vmatmul.msk.bf16.gmra.mxu3 %vm488_vm0, %v1223_v36  ;;  %v778_v35 = vld [vmem:[%s1804_s4] sm:$0xff] }
  0x39   :  { %v990_v36 = vld [vmem:[%s1805_s6] sm:$0x1f] }
  0x3a   :  { %170 = vperm.xlu1 %1243, %v88_v37  }
  0x3b   :  { %335 = vperm.xlu0 %1242, %v121_v38  }
  0x3c   :  { %175 = vperm.xlu2 %1244, %v89_v39  }
  0x42   :  { %245 = vperm.xlu1 %1243, %v103_v40  }
  0x43   :  { %240 = vperm.xlu0 %1242, %v102_v41   ;;  %v1212_v41 = vld [vmem:[%s1803_s1 + $0x48] sm:$0xff] }
  0x44   :  { %320 = vperm.xlu2 %1244, %v118_v42  }
  0x47   :  { %1134 = vmatmul.msk.bf16.gmra.mxu0 %vm488_vm0, %v1207_v43 }
  0x48   :  { %1145 = vmatmul.msk.bf16.gmra.mxu2 %vm488_vm0, %v1218_v44  ;;  %1151 = vmatmul.msk.bf16.gmra.mxu3 %vm488_vm0, %v1224_v45 }
  0x4a   :  { %160 = vperm.xlu1 %1243, %v86_v46  }
  0x4b   :  { %325 = vperm.xlu0 %1242, %v119_v47  }
  0x4c   :  { %165 = vperm.xlu2 %1244, %v87_v48  }
  0x52   :  { %235 = vperm.xlu1 %1243, %v101_v49  }
  0x53   :  { %230 = vperm.xlu0 %1242, %v100_v50  }
  0x54   :  { %310 = vperm.xlu2 %1244, %v116_v51  }
  0x57   :  { %1135 = vmatmul.msk.bf16.gmra.mxu0 %vm488_vm0, %v1208_v52 }
  0x58   :  { %1146 = vmatmul.msk.bf16.gmra.mxu2 %vm488_vm0, %v1219_v53  ;;  %1152 = vmatmul.msk.bf16.gmra.mxu3 %vm488_vm0, %v1225_v54  ;;  %v1213_v53 = vld [vmem:[%s1803_s1 + $0x50] sm:$0xff] }
  0x5a   :  { %150 = vperm.xlu1 %1243, %v84_v55  }
  0x5b   :  { %315 = vperm.xlu0 %1242, %v117_v56  }
  0x5c   :  { %155 = vperm.xlu2 %1244, %v85_v57  }
  0x5e   :  { %v1477_v58 = vpop.permute.xlu2 %200 }
  0x62   :  { %225 = vperm.xlu1 %1243, %v99_v59  }
  0x63   :  { %220 = vperm.xlu0 %1242, %v98_v60  }
  0x64   :  { %300 = vperm.xlu2 %1244, %v114_v61  }
  0x66   :  { %v1491_v63 = vpop.permute.xlu2 %205 }
  0x67   :  { %1136 = vmatmul.msk.bf16.gmra.mxu0 %vm488_vm0, %v1209_v62 }
  0x68   :  { %1153 = vmatmul.msk.bf16.gmra.mxu3 %vm488_vm0, %v1226_v0 }
  0x6a   :  { %140 = vperm.xlu1 %1243, %v82_v1  }
  0x6b   :  { %305 = vperm.xlu0 %1242, %v115_v2  }
  0x6c   :  { %145 = vperm.xlu2 %1244, %v83_v3  }
  0x6e   :  { %v1507_v4 = vpop.permute.xlu2 %350 }
  0x72   :  { %215 = vperm.xlu1 %1243, %v97_v5  }
  0x73   :  { %210 = vperm.xlu0 %1242, %v96_v6  }
  0x74   :  { %290 = vperm.xlu2 %1244, %v112_v7   ;;  %v1518_v8 = vpop.permute.xlu1 %360 }
  0x75   :  { %v1523_v10 = vpop.permute.xlu0 %280 }
  0x76   :  { %v1525_v11 = vpop.permute.xlu2 %195 }
  0x77   :  { %1137 = vmatmul.msk.bf16.gmra.mxu0 %vm488_vm0, %v1210_v9 }
  0x7a   :  { %130 = vperm.xlu1 %1243, %v80_v12  }
  0x7b   :  { %295 = vperm.xlu0 %1242, %v113_v13  }
  0x7c   :  { %135 = vperm.xlu2 %1244, %v81_v14   ;;  %v1537_v15 = vpop.permute.xlu1 %365 }
  0x7d   :  { %v1539_v16 = vpop.permute.xlu0 %285 }
  0x7e   :  { %v1541_v17 = vpop.permute.xlu2 %340 }
  0x82   :  { %823 = vperm.xlu1 %1243, %v785_v18  }
  0x83   :  { %818 = vperm.xlu0 %1242, %v784_v19  }
  0x84   :  { %808 = vperm.xlu2 %1244, %v782_v20   ;;  %v1552_v21 = vpop.permute.xlu1 %275  ;;  %v1559_v24 = vpop.f32.mrf.mxu0 }
  0x85   :  { %v1557_v23 = vpop.permute.xlu0 %270 }
  0x86   :  { %v1561_v25 = vpop.permute.xlu2 %185 }
  0x87   :  { %1138 = vmatmul.msk.bf16.gmra.mxu0 %vm488_vm0, %v1211_v22 }
  0x8a   :  { %798 = vperm.xlu1 %1243, %v780_v26  }
  0x8b   :  { %813 = vperm.xlu0 %1242, %v783_v27   ;;  %v625_v29 = vpop.f32.mrf.mxu2  ;;  %v1573_v30 = vpop.f32.mrf.mxu3 }
  0x8c   :  { %803 = vperm.xlu2 %1244, %v781_v28   ;;  %v1575_v31 = vpop.permute.xlu1 %190  ;;  %v1579_v33 = vpop.f32.mrf.mxu0 }
  0x8d   :  { %v1577_v32 = vpop.permute.xlu0 %355 }
  0x8e   :  { %v1590_v37 = vpop.permute.xlu2 %330 }
  0x92   :  { %793 = vperm.xlu1 %1243, %v779_v34  }
  0x93   :  { %788 = vperm.xlu0 %1242, %v778_v35   ;;  %v627_v38 = vpop.f32.mrf.mxu2  ;;  %v1592_v39 = vpop.f32.mrf.mxu3 }
  0x94   :  { %993 = vperm.xlu2 %1244, %v990_v36   ;;  %v1594_v40 = vpop.permute.xlu1 %265  ;;  %v1601_v43 = vpop.f32.mrf.mxu0 }
  0x95   :  { %v1599_v42 = vpop.permute.xlu0 %260 }
  0x96   :  { %v1604_v44 = vpop.permute.xlu2 %175 }
  0x97   :  { %1139 = vmatmul.msk.bf16.gmra.mxu0 %vm488_vm0, %v1212_v41 }
  0x9b   :  { %v1606_v45 = vpop.f32.mrf.mxu2  ;;  %v660_v46 = vpop.f32.mrf.mxu3 }
  0x9c   :  { %v1608_v47 = vpop.permute.xlu1 %180  ;;  %v1612_v49 = vpop.f32.mrf.mxu0 }
  0x9d   :  { %v1610_v48 = vpop.permute.xlu0 %345 }
  0x9e   :  { %v321_v54 = vpop.permute.xlu2 %320 }
  0xa3   :  { %v1614_v50 = vpop.f32.mrf.mxu2  ;;  %v662_v51 = vpop.f32.mrf.mxu3 }
  0xa4   :  { %v1616_v52 = vpop.permute.xlu1 %255  ;;  %v580_v56 = vpop.f32.mrf.mxu0 }
  0xa5   :  { %v1621_v55 = vpop.permute.xlu0 %250 }
  0xa6   :  { %v166_v0 = vpop.permute.xlu2 %165 }
  0xa7   :  { %1140 = vmatmul.msk.bf16.gmra.mxu0 %vm488_vm0, %v1213_v53 }
  0xab   :  { %v1624_v57 = vpop.f32.mrf.mxu2  ;;  %v665_v59 = vpop.f32.mrf.mxu3 }
  0xac   :  { %v1626_v60 = vpop.permute.xlu1 %170  ;;  %v582_v62 = vpop.f32.mrf.mxu0  ;;  %v666_v18 = vadd.f32 %v665_v59, %v321_v54 }
  0xad   :  { %v1628_v61 = vpop.permute.xlu0 %335 }
  0xae   :  { %v311_v14 = vpop.permute.xlu2 %310  ;;  %v728_v34 = vmax.f32 %v666_v18, 0.0 }
  0xaf   :  { %v661_v18 = vadd.f32 %v660_v46, %v311_v14 }
  0xb3   :  { %v637_v1 = vpop.f32.mrf.mxu2  ;;  %v667_v2 = vpop.f32.mrf.mxu3 }
  0xb4   :  { %v246_v3 = vpop.permute.xlu1 %245  ;;  %v585_v9 = vpop.f32.mrf.mxu0 }
  0xb5   :  { %v241_v5 = vpop.permute.xlu0 %240  ;;  %v628_v6 = vadd.f32 %v627_v38, %v246_v3 }
  0xb6   :  { %v626_v7 = vadd.f32 %v625_v29, %v241_v5  ;;  %v156_v5 = vpop.permute.xlu2 %155 }
  0xb7   :  { %v713_v12 = vmax.f32 %v628_v6, 0.0 }
  0xb8   :  { %v712_v13 = vmax.f32 %v626_v7, 0.0 }
  0xba   :  { %v1630_v19 = vpack.c.bf16 %v713_v12, %v712_v13 }
  0xbb   :  { %v640_v20 = vpop.f32.mrf.mxu2  ;;  %v1632_v22 = vpop.f32.mrf.mxu3 }
  0xbc   :  { %v161_v26 = vpop.permute.xlu1 %160  ;;  %v587_v36 = vpop.f32.mrf.mxu0 }
  0xbd   :  { %v326_v27 = vpop.permute.xlu0 %325  ;;  %v586_v28 = vadd.f32 %v585_v9, %v161_v26  ;;  %v588_v53 = vadd.f32 %v587_v36, %v166_v0 }
  0xbe   :  { %v668_v35 = vadd.f32 %v667_v2, %v326_v27  ;;  %v583_v2 = vadd.f32 %v582_v62, %v156_v5 }
  0xbf   :  { %v696_v41 = vmax.f32 %v586_v28, 0.0  ;;  %v697_v29 = vmax.f32 %v588_v53, 0.0 }
  0xc0   :  { %v729_v38 = vmax.f32 %v668_v35, 0.0 }
  0xc1   :  { %v1636_v54 = vpack.c.bf16 %v697_v29, %v696_v41  ;;  %v695_v41 = vmax.f32 %v583_v2, 0.0 }
  0xc2   :  { %v1634_v3 = vpack.c.bf16 %v729_v38, %v728_v34  ;;  %v1648_v34 = vpop.permute.xlu2 %300  ;;  %v726_v38 = vmax.f32 %v661_v18, 0.0 }
  0xc3   :  { %v642_v6 = vpop.f32.mrf.mxu2  ;;  %v1638_v59 = vpop.f32.mrf.mxu3 }
  0xc4   :  { %v1640_v7 = vpop.permute.xlu1 %235  ;;  %v1644_v9 = vpop.f32.mrf.mxu0  ;;  %v643_v14 = vadd.f32 %v642_v6, %v1552_v21 }
  0xc5   :  { %1810 = vst [vmem:[#allocation2_spill] sm:$0xff] %v1640_v7  ;;  %v1642_v12 = vpop.permute.xlu0 %230 }
  0xc6   :  { %1811 = vst [vmem:[#allocation3_spill] sm:$0xff] %v1642_v12 }
  0xcb   :  { %v645_v13 = vpop.f32.mrf.mxu2  ;;  %v1646_v0 = vpop.f32.mrf.mxu3 }
  0xcc   :  { %v151_v26 = vpop.permute.xlu1 %150  ;;  %v1650_v36 = vpop.f32.mrf.mxu0  ;;  %v646_v62 = vadd.f32 %v645_v13, %v1523_v10  ;;  %v638_v10 = vadd.f32 %v637_v1, %v1594_v40  ;;  %v719_v13 = vmax.f32 %v643_v14, 0.0 }
  0xcd   :  { %v316_v27 = vpop.permute.xlu0 %315  ;;  %v581_v28 = vadd.f32 %v580_v56, %v151_v26 }
  0xce   :  { %v663_v35 = vadd.f32 %v662_v51, %v316_v27  ;;  %v641_v51 = vadd.f32 %v640_v20, %v1557_v23  ;;  %v720_v2 = vmax.f32 %v646_v62, 0.0  ;;  %v631_v23 = vadd.f32 %v1606_v45, %v1621_v55 }
  0xcf   :  { %v694_v53 = vmax.f32 %v581_v28, 0.0  ;;  %v636_v28 = vadd.f32 %v1624_v57, %v1599_v42 }
  0xd0   :  { %v727_v29 = vmax.f32 %v663_v35, 0.0  ;;  %v146_v35 = vpop.permute.xlu2 %145  ;;  %v718_v21 = vmax.f32 %v641_v51, 0.0 }
  0xd1   :  { %v1652_v7 = vpack.c.bf16 %v695_v41, %v694_v53  ;;  %v578_v6 = vadd.f32 %v1612_v49, %v146_v35  ;;  %v716_v20 = vmax.f32 %v636_v28, 0.0  ;;  %v717_v53 = vmax.f32 %v638_v10, 0.0 }
  0xd2   :  { %v1655_v5 = vpack.c.bf16 %v727_v29, %v726_v38  ;;  %v768_v42 = vpack.c.bf16 %v719_v13, %v718_v21 }
  0xd3   :  { %v647_v46 = vpop.f32.mrf.mxu2  ;;  %v677_v26 = vpop.f32.mrf.mxu3  ;;  %v693_v1 = vmax.f32 %v578_v6, 0.0 }
  0xd4   :  { %v648_v56 = vadd.f32 %v647_v46, %v1539_v16  ;;  %v1659_v12 = vpop.permute.xlu1 %225  ;;  %v1662_v18 = vpop.f32.mrf.mxu0  ;;  %v633_v16 = vadd.f32 %v1614_v50, %v1616_v52  ;;  %v714_v46 = vmax.f32 %v631_v23, 0.0  ;;  %v678_v6 = vadd.f32 %v677_v26, %v1610_v48 }
  0xd5   :  { %v1676_v55 = vpop.permute.xlu0 %220 }
  0xd6   :  { %v721_v27 = vmax.f32 %v648_v56, 0.0  ;;  %v715_v14 = vmax.f32 %v633_v16, 0.0  ;;  %v767_v56 = vpack.c.bf16 %v717_v53, %v716_v20  ;;  %v676_v20 = vadd.f32 %v1646_v0, %v1541_v17 }
  0xd8   :  { %v769_v41 = vpack.c.bf16 %v721_v27, %v720_v2  ;;  %v766_v52 = vpack.c.bf16 %v715_v14, %v714_v46 }
  0xda   :  { %919 = vmatpush.bf16.msrb.mxu2 %v769_v41 }
  0xdb   :  { %v680_v38 = vpop.f32.mrf.mxu3 }
  0xdc   :  { %v141_v29 = vpop.permute.xlu1 %140  ;;  %v597_v57 = vpop.f32.mrf.mxu0  ;;  %v681_v41 = vadd.f32 %v680_v38, %v1507_v4  ;;  %v671_v4 = vadd.f32 %v1632_v22, %v1590_v37  ;;  %v732_v38 = vmax.f32 %v676_v20, 0.0 }
  0xdd   :  { %v576_v40 = vadd.f32 %v1601_v43, %v141_v29  ;;  %v306_v13 = vpop.permute.xlu0 %305  ;;  %v598_v46 = vadd.f32 %v597_v57, %v1561_v25  ;;  %v591_v25 = vadd.f32 %v1644_v9, %v1626_v60 }
  0xde   :  { %920 = vmatpush.bf16.msrb.mxu2 %v768_v42  ;;  %v734_v53 = vmax.f32 %v681_v41, 0.0 }
  0xdf   :  { %v692_v62 = vmax.f32 %v576_v40, 0.0  ;;  %v650_v40 = vpop.f32.mrf.mxu2 }
  0xe1   :  { %v1673_v50 = vpack.c.bf16 %v693_v1, %v692_v62  ;;  %v730_v62 = vmax.f32 %v671_v4, 0.0  ;;  %v1812_v4 = vld [vmem:[#allocation3_spill] sm:$0xff] }
  0xe2   :  { %921 = vmatpush.bf16.msrb.mxu2 %v767_v56 }
  0xe3   :  { %v682_v49 = vpop.f32.mrf.mxu3 }
  0xe4   :  { %v600_v45 = vpop.f32.mrf.mxu0  ;;  %v683_v28 = vadd.f32 %v682_v49, %v1577_v32  ;;  %v733_v32 = vmax.f32 %v678_v6, 0.0  ;;  %v701_v49 = vmax.f32 %v598_v46, 0.0 }
  0xe5   :  { %v1692_v0 = vpop.permute.xlu0 %210 }
  0xe6   :  { %922 = vmatpush.bf16.msrb.mxu2 %v766_v52 }
  0xea   :  { %923 = vmatpush.bf16.msrb.mxu2 %v1630_v19  ;;  %v735_v19 = vmax.f32 %v683_v28, 0.0 }
  0xeb   :  { %v685_v51 = vpop.f32.mrf.mxu3 }
  0xec   :  { %v602_v43 = vpop.f32.mrf.mxu0  ;;  %v686_v2 = vadd.f32 %v685_v51, %v1518_v8  ;;  %v673_v8 = vadd.f32 %v1638_v59, %v1628_v61  ;;  %v776_v29 = vpack.c.bf16 %v735_v19, %v734_v53  ;;  %v601_v61 = vadd.f32 %v600_v45, %v1575_v31  ;;  %v652_v51 = vpop.f32.mrf.mxu2  ;;  %v1164_v19 = vld [vmem:[%s1806_s3 + $0x8] sm:$0xf] }
  0xed   :  { %v603_v48 = vadd.f32 %v602_v43, %v1525_v11  ;;  %v596_v11 = vadd.f32 %v1662_v18, %v1608_v47  ;;  %v593_v31 = vadd.f32 %v1650_v36, %v1604_v44  ;;  %v658_v45 = vadd.f32 %v1592_v39, %v306_v13  ;;  %v216_v47 = vpop.permute.xlu1 %215  ;;  %v296_v18 = vpop.permute.xlu0 %295 }
  0xee   :  { %v736_v21 = vmax.f32 %v686_v2, 0.0  ;;  %v731_v17 = vmax.f32 %v673_v8, 0.0  ;;  %v656_v43 = vadd.f32 %v1573_v30, %v1648_v34  ;;  %v291_v36 = vpop.permute.xlu2 %290  ;;  %v1228_v8 = vld [vmem:[%s1806_s3 + $0x8] sm:$0xf0] }
  0xef   :  { %v703_v14 = vmax.f32 %v603_v48, 0.0  ;;  %v700_v57 = vmax.f32 %v596_v11, 0.0  ;;  %v699_v2 = vmax.f32 %v593_v31, 0.0  ;;  %v725_v28 = vmax.f32 %v658_v45, 0.0  ;;  %v1168_v48 = vld [vmem:[%s1806_s3 + $0x18] sm:$0xf] }
  0xf0   :  { %v774_v22 = vpack.c.bf16 %v731_v17, %v730_v62  ;;  %v724_v9 = vmax.f32 %v656_v43, 0.0  ;;  %v1158_v45 = vld [vmem:[%s1806_s3 + $0xc] sm:$0xf0] }
  0xf1   :  { %v759_v44 = vpack.c.bf16 %v701_v49, %v700_v57  ;;  %v1227_v57 = vld [vmem:[%s1806_s3 + $0x4] sm:$0xf]  ;;  %v1200_v43 = vld [vmem:[%s1806_s3 + $0x50] sm:$0xf] }
  0xf2   :  { %v771_v41 = vpack.c.bf16 %v725_v28, %v724_v9 }
  0xf3   :  { %v687_v27 = vpop.f32.mrf.mxu3 }
  0xf4   :  { %v688_v10 = vadd.f32 %v687_v27, %v1537_v15  ;;  %v605_v35 = vpop.f32.mrf.mxu0  ;;  %v698_v27 = vmax.f32 %v591_v25, 0.0 }
  0xf5   :  { %v606_v15 = vadd.f32 %v605_v35, %v1477_v58  ;;  %v775_v58 = vpack.c.bf16 %v733_v32, %v732_v38  ;;  %v651_v35 = vadd.f32 %v650_v40, %v291_v36  ;;  %v131_v30 = vpop.permute.xlu1 %130  ;;  %v1230_v36 = vld [vmem:[%s1806_s3 + $0x1c] sm:$0xf] }
  0xf6   :  { %v737_v16 = vmax.f32 %v688_v10, 0.0  ;;  %v653_v10 = vadd.f32 %v652_v51, %v296_v18  ;;  %v758_v39 = vpack.c.bf16 %v699_v2, %v698_v27  ;;  %v136_v34 = vpop.permute.xlu2 %135  ;;  %v571_v6 = vadd.f32 %v1559_v24, %v131_v30  ;;  %v1156_v24 = vld [vmem:[%s1806_s3] sm:$0xf]  ;;  %v1238_v2 = vld [vmem:[%s1806_s3 + $0x58] sm:$0xf0] }
  0xf7   :  { %v704_v59 = vmax.f32 %v606_v15, 0.0  ;;  %v573_v20 = vadd.f32 %v1579_v33, %v136_v34  ;;  %v1176_v33 = vld [vmem:[%s1806_s3 + $0x20] sm:$0xf]  ;;  %v1170_v27 = vld [vmem:[%s1806_s3 + $0x24] sm:$0xf0] }
  0xf8   :  { %v777_v23 = vpack.c.bf16 %v737_v16, %v736_v21  ;;  %v723_v13 = vmax.f32 %v653_v10, 0.0  ;;  %v722_v21 = vmax.f32 %v651_v35, 0.0  ;;  %v1173_v28 = vor.u32 %v1230_v36, %v1170_v27  ;;  %v1192_v10 = vld [vmem:[%s1806_s3 + $0x48] sm:$0xf]  ;;  %v1233_v35 = vld [vmem:[%s1806_s3 + $0x34] sm:$0xf] }
  0xf9   :  { %v691_v53 = vmax.f32 %v573_v20, 0.0 }
  0xfa   :  { %948 = vmatpush.bf16.msrb.mxu3 %v777_v23 }
  0xfc   :  { %v607_v42 = vpop.f32.mrf.mxu0 }
  0xfd   :  { %v608_v26 = vadd.f32 %v607_v42, %v1491_v63  ;;  %v702_v63 = vmax.f32 %v601_v61, 0.0  ;;  %v1813_v61 = vld [vmem:[#allocation2_spill] sm:$0xff] }
  0xfe   :  { %949 = vmatpush.bf16.msrb.mxu3 %v776_v29  ;;  %v1157_v29 = vor.u32 %v1228_v8, %v1156_v24 }
  0xff   :  { %v705_v1 = vmax.f32 %v608_v26, 0.0  ;;  %v760_v52 = vpack.c.bf16 %v703_v14, %v702_v63  ;;  %v1231_v26 = vld [vmem:[%s1806_s3 + $0x20] sm:$0xf0]  ;;  %v1188_v63 = vld [vmem:[%s1806_s3 + $0x38] sm:$0xf] }
 0x101   :  { %v761_v37 = vpack.c.bf16 %v705_v1, %v704_v59  ;;  %v1169_v1 = vor.u32 %v1231_v26, %v1168_v48 }
 0x102   :  { %950 = vmatpush.bf16.msrb.mxu3 %v775_v58 }
 0x103   :  { %890 = vmatpush.bf16.msra.mxu1 %v761_v37 }
 0x104   :  { %v1698_v56 = vpop.f32.mrf.mxu0 }
 0x106   :  { %951 = vmatpush.bf16.msrb.mxu3 %v774_v22  ;;  %v1235_v22 = vld [vmem:[%s1806_s3 + $0x40] sm:$0xf0] }
 0x107   :  { %891 = vmatpush.bf16.msra.mxu1 %v760_v52 }
 0x10a   :  { %952 = vmatpush.bf16.msrb.mxu3 %v1634_v3  ;;  %v770_v3 = vpack.c.bf16 %v723_v13, %v722_v21  ;;  %v1194_v21 = vld [vmem:[%s1806_s3 + $0x54] sm:$0xf0] }
 0x10b   :  { %892 = vmatpush.bf16.msra.mxu1 %v759_v44  ;;  %v1201_v44 = vor.u32 %v1238_v2, %v1200_v43 }
 0x10c   :  { %v612_v60 = vpop.f32.mrf.mxu0 }
 0x10d   :  { %v613_v14 = vadd.f32 %v612_v60, %v216_v47  ;;  %v1161_v47 = vor.u32 %v1227_v57, %v1158_v45  ;;  %v1237_v60 = vld [vmem:[%s1806_s3 + $0x50] sm:$0xf0] }
 0x10e   :  { %953 = vmatpush.bf16.msrb.mxu3 %v1655_v5  ;;  %v1229_v5 = vld [vmem:[%s1806_s3 + $0x10] sm:$0xf0]  ;;  %v1193_v9 = vor.u32 %v1237_v60, %v1192_v10 }
 0x10f   :  { %893 = vmatpush.bf16.msra.mxu1 %v758_v39  ;;  %v1165_v23 = vor.u32 %v1229_v5, %v1164_v19  ;;  %v707_v49 = vmax.f32 %v613_v14, 0.0  ;;  %v1182_v39 = vld [vmem:[%s1806_s3 + $0x3c] sm:$0xf0] }
 0x110   :  { %v1185_v13 = vor.u32 %v1233_v35, %v1182_v39 }
 0x112   :  { %954 = vmatpush.bf16.msrb.mxu3 %v771_v41  ;;  %v1236_v41 = vld [vmem:[%s1806_s3 + $0x4c] sm:$0xf] }
 0x113   :  { %894 = vmatpush.bf16.msra.mxu1 %v1636_v54  ;;  %v690_v54 = vmax.f32 %v571_v6, 0.0  ;;  %v1197_v30 = vor.u32 %v1236_v41, %v1194_v21 }
 0x114   :  { %v615_v16 = vpop.f32.mrf.mxu0 }
 0x115   :  { %v754_v15 = vpack.c.bf16 %v691_v53, %v690_v54  ;;  %v616_v58 = vadd.f32 %v615_v16, %v1676_v55  ;;  %v1189_v55 = vor.u32 %v1235_v22, %v1188_v63 }
 0x116   :  { %955 = vmatpush.bf16.msrb.mxu3 %v770_v3  ;;  %v819_v3 = vpop.permute.xlu0 %818 }
 0x117   :  { %895 = vmatpush.bf16.msra.mxu1 %v1652_v7  ;;  %v1232_v7 = vld [vmem:[%s1806_s3 + $0x28] sm:$0xf0]  ;;  %v708_v31 = vmax.f32 %v616_v58, 0.0 }
 0x118   :  { %v1177_v42 = vor.u32 %v1232_v7, %v1176_v33 }
 0x119   :  { %956 = vmatmul.bf16.vlgmr.msrb.gmra.mxu3 %v1165_v23 }
 0x11b   :  { %896 = vmatpush.bf16.msra.mxu1 %v1673_v50 }
 0x11c   :  { %v617_v32 = vpop.f32.mrf.mxu0 }
 0x11d   :  { %v618_v40 = vadd.f32 %v617_v32, %v1659_v12  ;;  %v611_v12 = vadd.f32 %v1698_v56, %v1692_v0  ;;  %v1180_v0 = vld [vmem:[%s1806_s3 + $0x30] sm:$0xf]  ;;  %v1234_v56 = vld [vmem:[%s1806_s3 + $0x38] sm:$0xf0] }
 0x11e   :  { %v1181_v18 = vor.u32 %v1234_v56, %v1180_v0  ;;  %v814_v16 = vpop.permute.xlu0 %813 }
 0x11f   :  { %897 = vmatpush.bf16.msra.mxu1 %v754_v15  ;;  %v709_v37 = vmax.f32 %v618_v40, 0.0  ;;  %v706_v25 = vmax.f32 %v611_v12, 0.0 }
 0x121   :  { %v763_v52 = vpack.c.bf16 %v709_v37, %v708_v31  ;;  %v762_v51 = vpack.c.bf16 %v707_v49, %v706_v25 }
 0x122   :  { %898 = vmatmul.bf16.vlgmr.msra.gmra.mxu1 %v1157_v29 }
 0x124   :  { %v620_v50 = vpop.f32.mrf.mxu0 }
 0x125   :  { %v621_v38 = vadd.f32 %v620_v50, %v1812_v4 }
 0x126   :  { %v789_v5 = vpop.permute.xlu0 %788 }
 0x127   :  { %v710_v62 = vmax.f32 %v621_v38, 0.0 }
 0x129   :  { %961 = vmatmul.bf16.gmra.mxu3 %v1177_v42 }
 0x12c   :  { %v622_v17 = vpop.f32.mrf.mxu0 }
 0x12d   :  { %v623_v59 = vadd.f32 %v622_v17, %v1813_v61  ;;  %v824_v17 = vpop.permute.xlu1 %823 }
 0x12f   :  { %v711_v46 = vmax.f32 %v623_v59, 0.0  ;;  %v809_v59 = vpop.permute.xlu2 %808 }
 0x131   :  { %v764_v11 = vpack.c.bf16 %v711_v46, %v710_v62 }
 0x132   :  { %903 = vmatmul.bf16.gmra.mxu1 %v1169_v1 }
 0x133   :  { %924 = vmatpush.bf16.msrb.mxu2 %v764_v11 }
 0x135   :  { %v799_v62 = vpop.permute.xlu1 %798 }
 0x137   :  { %925 = vmatpush.bf16.msrb.mxu2 %v763_v52  ;;  %v804_v31 = vpop.permute.xlu2 %803 }
 0x139   :  { %966 = vmatmul.bf16.gmra.mxu3 %v1189_v55 }
 0x13b   :  { %926 = vmatpush.bf16.msrb.mxu2 %v762_v51 }
 0x13d   :  { %v794_v51 = vpop.permute.xlu1 %793 }
 0x13e   :  { %927 = vmatmul.bf16.vlgmr.msrb.gmra.mxu2 %v1161_v47 }
 0x142   :  { %908 = vmatmul.bf16.gmra.mxu1 %v1181_v18 }
 0x149   :  { %971 = vmatmul.bf16.gmra.mxu3 %v1201_v44 }
 0x14e   :  { %932 = vmatmul.bf16.gmra.mxu2 %v1173_v28 }
 0x152   :  { %913 = vmatmul.bf16.gmra.mxu1 %v1193_v9 }
 0x15e   :  { %937 = vmatmul.bf16.gmra.mxu2 %v1185_v13 }
 0x16e   :  { %942 = vmatmul.bf16.gmra.mxu2 %v1197_v30 }
 0x19c   :  { %v957_v6 = vpop.f32.mrf.mxu3 }
 0x19f   :  { %v899_v34 = vpop.f32.mrf.mxu1 }
 0x1a0   :  { %v900_v20 = vadd.f32 %v899_v34, %v789_v5  ;;  %v994_v5 = vpop.permute.xlu2 %993 }
 0x1a4   :  { %v959_v23 = vpop.f32.mrf.mxu3 }
 0x1a7   :  { %v901_v19 = vpop.f32.mrf.mxu1 }
 0x1a8   :  { %v902_v43 = vadd.f32 %v901_v19, %v794_v51  ;;  %v985_v19 = vld [vmem:[%s1807_s5] sm:$0x7] }
 0x1ac   :  { %v962_v15 = vpop.f32.mrf.mxu3 }
 0x1af   :  { %v904_v24 = vpop.f32.mrf.mxu1 }
 0x1b0   :  { %v905_v47 = vadd.f32 %v904_v24, %v799_v62 }
 0x1b4   :  { %v964_v7 = vpop.f32.mrf.mxu3 }
 0x1b7   :  { %v906_v29 = vpop.f32.mrf.mxu1 }
 0x1b8   :  { %v907_v49 = vadd.f32 %v906_v29, %v804_v31 }
 0x1bc   :  { %v967_v4 = vpop.f32.mrf.mxu3 }
 0x1bf   :  { %v909_v50 = vpop.f32.mrf.mxu1 }
 0x1c0   :  { %v910_v63 = vadd.f32 %v909_v50, %v809_v59 }
 0x1c1   :  { %v928_v54 = vpop.f32.mrf.mxu2 }
 0x1c2   :  { %v929_v53 = vadd.f32 %v928_v54, %v900_v20 }
 0x1c4   :  { %v958_v8 = vadd.f32 %v957_v6, %v929_v53  ;;  %v969_v26 = vpop.f32.mrf.mxu3 }
 0x1c7   :  { %v911_v38 = vpop.f32.mrf.mxu1 }
 0x1c8   :  { %v912_v37 = vadd.f32 %v911_v38, %v814_v16  ;;  %v977_v16 = vmax.f32 %v958_v8, 0.0 }
 0x1c9   :  { %v930_v32 = vpop.f32.mrf.mxu2 }
 0x1ca   :  { %v931_v28 = vadd.f32 %v930_v32, %v902_v43 }
 0x1cc   :  { %v972_v1 = vpop.f32.mrf.mxu3  ;;  %v960_v13 = vadd.f32 %v959_v23, %v931_v28 }
 0x1cf   :  { %v914_v61 = vpop.f32.mrf.mxu1 }
 0x1d0   :  { %v915_v46 = vadd.f32 %v914_v61, %v819_v3  ;;  %v978_v3 = vmax.f32 %v960_v13, 0.0 }
 0x1d1   :  { %v933_v33 = vpop.f32.mrf.mxu2 }
 0x1d2   :  { %v934_v2 = vadd.f32 %v933_v33, %v905_v47  ;;  %v986_v6 = vpack.c.bf16 %v978_v3, %v977_v16 }
 0x1d4   :  { %v974_v45 = vpop.f32.mrf.mxu3  ;;  %v963_v35 = vadd.f32 %v962_v15, %v934_v2 }
 0x1d6   :  { %v979_v30 = vmax.f32 %v963_v35, 0.0 }
 0x1d7   :  { %v916_v14 = vpop.f32.mrf.mxu1 }
 0x1d8   :  { %v917_v22 = vadd.f32 %v916_v14, %v824_v17 }
 0x1d9   :  { %v935_v42 = vpop.f32.mrf.mxu2 }
 0x1da   :  { %v936_v0 = vadd.f32 %v935_v42, %v907_v49 }
 0x1dc   :  { %v965_v10 = vadd.f32 %v964_v7, %v936_v0 }
 0x1de   :  { %v980_v41 = vmax.f32 %v965_v10, 0.0 }
 0x1e0   :  { %v987_v34 = vpack.c.bf16 %v980_v41, %v979_v30 }
 0x1e1   :  { %v938_v48 = vpop.f32.mrf.mxu2 }
 0x1e2   :  { %v939_v52 = vadd.f32 %v938_v48, %v910_v63 }
 0x1e4   :  { %v968_v44 = vadd.f32 %v967_v4, %v939_v52 }
 0x1e6   :  { %v981_v39 = vmax.f32 %v968_v44, 0.0 }
 0x1e9   :  { %v940_v40 = vpop.f32.mrf.mxu2 }
 0x1ea   :  { %v941_v12 = vadd.f32 %v940_v40, %v912_v37 }
 0x1ec   :  { %v970_v56 = vadd.f32 %v969_v26, %v941_v12 }
 0x1ee   :  { %v982_v60 = vmax.f32 %v970_v56, 0.0 }
 0x1f0   :  { %v988_v21 = vpack.c.bf16 %v982_v60, %v981_v39 }
 0x1f1   :  { %v943_v58 = vpop.f32.mrf.mxu2 }
 0x1f2   :  { %v944_v11 = vadd.f32 %v943_v58, %v915_v46 }
 0x1f4   :  { %v973_v25 = vadd.f32 %v972_v1, %v944_v11 }
 0x1f6   :  { %v983_v36 = vmax.f32 %v973_v25, 0.0 }
 0x1f9   :  { %v945_v55 = vpop.f32.mrf.mxu2 }
 0x1fa   :  { %v946_v57 = vadd.f32 %v945_v55, %v917_v22 }
 0x1fc   :  { %v975_v18 = vadd.f32 %v974_v45, %v946_v57 }
 0x1fe   :  { %v984_v27 = vmax.f32 %v975_v18, 0.0 }
 0x200   :  { %v989_v9 = vpack.c.bf16 %v984_v27, %v983_v36 }
 0x202   :  { %1004 = vmatpush.bf16.msrb.mxu1 %v989_v9 }
 0x206   :  { %1005 = vmatpush.bf16.msrb.mxu1 %v988_v21 }
 0x20a   :  { %1006 = vmatpush.bf16.msrb.mxu1 %v987_v34 }
 0x20e   :  { %1007 = vmatpush.bf16.msrb.mxu1 %v986_v6 }
 0x211   :  { %1202 = vmatmul.msk.bf16.vlgmr.msrb.gmra.mxu1 %vm996_vm1, %v985_v19 }
 0x28e   :  { %v1009_v20 = vpop.f32.mrf.mxu1 }
 0x28f   :  { %v1010_v23 = vadd.f32 %v1009_v20, %v994_v5 }
 0x291   :  { %v1013_v54 = vperm.slane %v1010_v23, 4  ;;  %v1017_v53 = vsel %vm1015_vm2, %v1010_v23, 0.0 }
 0x292   :  { %v1018_v24 = vrot.slane %v1017_v53, 4 }
 0x293   :  { %v1014_v32 = vadd.f32 %v1013_v54, %v1010_v23 }
 0x294   :  { %v1019_v15 = vadd.f32 %v1018_v24, %v1017_v53 }
 0x295   :  { %1016 = vst.msk [vmem:[%s1808_s7] sm:$0xf] %vm1015_vm2, %v1014_v32 }
 0x296   :  { %v1020_v8 = vrot.slane %v1019_v15, 2  ;;  %v1011_v29 = vpop.f32.mrf.mxu1 }
 0x298   :  { %v1021_v33 = vadd.f32 %v1020_v8, %v1019_v15 }
 0x29a   :  { %v1022_v7 = vrot.slane %v1021_v33, 1 }
 0x29c   :  { %v1023_v50 = vadd.f32 %v1022_v7, %v1021_v33 }
 0x29e   :  { %1025 = vst.msk [vmem:[%s1809_s8] sm:$0x1] %vm1024_vm3, %v1023_v50 }

</bundles_post_ra>
